<compile_context>
chip_gen: v7x
topology: tpu7x:2x2x1
jax: 0.10.0
libtpu: 0.0.40
codegen_flags: <defaults>
</compile_context>

<pallas_src>
import functools

import jax
import jax.numpy as jnp
from jax import lax
from jax.experimental import pallas as pl
from jax.experimental.pallas import tpu as pltpu

N_TYPE = 18          # one_hot(items[:, :, 1], 18)
N_EQUIP = 2          # one_hot(items[:, :, 14], 2)
N_CONT = 12          # continuous_idxs = [3..13, 15]
EMB = N_TYPE + N_EQUIP + N_CONT   # 32 = Linear input size
CONT_SCALE = 1.0 / 100.0


def _item_encoder_kernel(items_ref, w_ref, b_ref, out_ref):
    # items_ref : (tm, F)   f32 raw item features
    # w_ref     : (EMB, H)  f32 fc weight (in x out, cont rows pre-scaled)
    # b_ref     : (1, H)    f32 fc bias
    # out_ref   : (tm, H)
    items = items_ref[...]
    tm = items.shape[0]

    # --- discrete one-hots (match F.one_hot(x.long(), num_classes)) -------
    type_id = items[:, 1:2].astype(jnp.int32)        # (tm, 1)
    equipped = items[:, 14:15].astype(jnp.int32)     # (tm, 1)

    iota_t = lax.broadcasted_iota(jnp.int32, (tm, N_TYPE), 1)
    one_hot_type = (iota_t == type_id).astype(jnp.float32)          # (tm, 18)
    iota_e = lax.broadcasted_iota(jnp.int32, (tm, N_EQUIP), 1)
    one_hot_eq = (iota_e == equipped).astype(jnp.float32)           # (tm, 2)

    # --- continuous features: columns [3..13] ++ [15] ----------------------
    # (1/100 scale already folded into w_ref rows 20:32 by the wrapper)
    cont = jnp.concatenate([items[:, 3:14], items[:, 15:16]],
                           axis=-1).astype(jnp.float32)             # (tm, 12)

    # --- single K=32 matmul on the materialized embedding ------------------
    emb = jnp.concatenate([one_hot_type, one_hot_eq, cont], axis=-1)  # (tm, 32)
    acc = jnp.dot(emb, w_ref[...], preferred_element_type=jnp.float32)
    out_ref[...] = (acc + b_ref[...]).astype(out_ref.dtype)


def _choose_tm(M):
    """Large row tile, but keep >= ~8 grid steps so v7x can use both TCs."""
    tm = 2048
    while tm > 64 and pl.cdiv(M, tm) < 8:
        tm //= 2
    tm = min(tm, ((M + 7) // 8) * 8)   # no point tiling past the row count
    return max(tm, 8)


@functools.partial(jax.jit, static_argnames=("tm", "out_dtype"))
def _item_encoder_impl(items, weight, bias, *, tm, out_dtype):
    B, N, F = items.shape
    H = weight.shape[0]
    M = B * N

    flat = items.reshape(M, F).astype(jnp.float32)

    # Weight to (in, out) layout; fold the 1/100 continuous scale into the
    # cont rows once here (trace-time XLA op, not per-tile kernel work).
    w_t = weight.T.astype(jnp.float32)                       # (EMB, H)
    w_t = w_t.at[N_TYPE + N_EQUIP:, :].multiply(CONT_SCALE)
    b2 = bias.reshape(1, H).astype(jnp.float32)              # (1, H)

    grid = (pl.cdiv(M, tm),)

    out = pl.pallas_call(
        _item_encoder_kernel,
        out_shape=jax.ShapeDtypeStruct((M, H), out_dtype),
        grid_spec=pltpu.PrefetchScalarGridSpec(
            num_scalar_prefetch=0,
            grid=grid,
            in_specs=[
                pl.BlockSpec((tm, F), lambda i: (i, 0)),
                pl.BlockSpec((EMB, H), lambda i: (0, 0)),
                pl.BlockSpec((1, H), lambda i: (0, 0)),
            ],
            out_specs=pl.BlockSpec((tm, H), lambda i: (i, 0)),
        ),
        compiler_params=pltpu.CompilerParams(
            dimension_semantics=("parallel",)),
    )(flat, w_t, b2)

    return out.reshape(B, N, H)


def item_encoder_forward(items, weight, bias, *, tm=None,
                         out_dtype=jnp.float32):
    """items: (B, N, F) f32; weight: (H, EMB) [PyTorch layout]; bias: (H,).

    out_dtype=jnp.bfloat16 halves HBM writeback if downstream tolerates it;
    default stays float32 to match the PyTorch module exactly.
    """
    B, N, _ = items.shape
    if tm is None:
        tm = _choose_tm(B * N)
    return _item_encoder_impl(items, weight, bias, tm=tm, out_dtype=out_dtype)


def reference_forward(items, weight, bias):
    """Pure-JAX replica of the PyTorch ItemEncoder.forward."""
    oh_eq = jax.nn.one_hot(items[:, :, 14].astype(jnp.int32), N_EQUIP,
                           dtype=jnp.float32)
    oh_ty = jax.nn.one_hot(items[:, :, 1].astype(jnp.int32), N_TYPE,
                           dtype=jnp.float32)
    cont_idx = [3, 4, 5, 6, 7, 8, 9, 10, 11, 12, 13, 15]
    cont = items[:, :, jnp.array(cont_idx)] * CONT_SCALE
    emb = jnp.concatenate([oh_ty, oh_eq, cont], axis=-1).astype(jnp.float32)
    return emb @ weight.T + bias


def _make_inputs(key, B, N, F, H):
    k_ty, k_eq, k_cont, k_w, k_b = jax.random.split(key, 5)
    items = jax.random.randint(k_cont, (B, N, F), 0, 100).astype(jnp.float32)
    type_id = jax.random.randint(k_ty, (B, N), 0, N_TYPE).astype(jnp.float32)
    equipped = jax.random.randint(k_eq, (B, N), 0, N_EQUIP).astype(jnp.float32)
    items = items.at[:, :, 1].set(type_id)
    items = items.at[:, :, 14].set(equipped)
    bound = 1.0 / jnp.sqrt(jnp.float32(EMB))
    weight = jax.random.uniform(k_w, (H, EMB), jnp.float32, -bound, bound)
    bias = jax.random.uniform(k_b, (H,), jnp.float32, -bound, bound)
    return items, weight, bias


if __name__ == "__main__":
    key = jax.random.PRNGKey(0)

    # Small shapes: batch=2, items-per-agent=8, 16 raw item features, hidden=32
    B, N, F, H = 2, 8, 16, 32
    items, weight, bias = _make_inputs(key, B, N, F, H)

    out = item_encoder_forward(items, weight, bias)
    out = jax.block_until_ready(out)
    ref = reference_forward(items, weight, bias)
    assert out.shape == (B, N, H), out.shape
    assert jnp.allclose(out, ref, atol=1e-5, rtol=1e-5), \
        float(jnp.max(jnp.abs(out - ref)))

    # Second check: ragged last tile (M = 1200 not a multiple of tm=128) to
    # verify Pallas partial-block masking keeps the output tail correct.
    B2, N2 = 4, 300
    items2, weight2, bias2 = _make_inputs(jax.random.PRNGKey(1), B2, N2, F, H)
    out2 = jax.block_until_ready(item_encoder_forward(items2, weight2, bias2))
    ref2 = reference_forward(items2, weight2, bias2)
    assert out2.shape == (B2, N2, H), out2.shape
    assert jnp.allclose(out2, ref2, atol=1e-5, rtol=1e-5), \
        float(jnp.max(jnp.abs(out2 - ref2)))

    print("KERNEL_OK")
</pallas_src>

<mosaic_0001>
module attributes {stable_mosaic.version = 11 : i64} {
  func.func @_item_encoder_kernel(%arg0: i32, %arg1: memref<16x16xf32, #tpu.memory_space<vmem>>, %arg2: memref<32x32xf32, #tpu.memory_space<vmem>>, %arg3: memref<1x32xf32, #tpu.memory_space<vmem>>, %arg4: memref<16x32xf32, #tpu.memory_space<vmem>>) attributes {dimension_semantics = [#tpu.dimension_semantics<parallel>], iteration_bounds = array<i64: 1>, scalar_prefetch = 0 : i64, scratch_operands = 0 : i64, tpu.core_type = #tpu.core_type<tc>, window_params = [{transform_indices = @transform_0, window_bounds = array<i64: 16, 16>}, {pipeline_mode = #tpu.pipeline_mode<synchronous>, transform_indices = @transform_1, window_bounds = array<i64: 32, 32>}, {pipeline_mode = #tpu.pipeline_mode<synchronous>, transform_indices = @transform_2, window_bounds = array<i64: 1, 32>}, {transform_indices = @transform_3, window_bounds = array<i64: 16, 32>}]} {
    %c0 = arith.constant 0 : index
    %c0_0 = arith.constant 0 : index
    %0 = vector.load %arg1[%c0, %c0_0] : memref<16x16xf32, #tpu.memory_space<vmem>>, vector<16x16xf32>
    %1 = vector.extract_strided_slice %0 {offsets = [0, 1], sizes = [16, 1], strides = [1, 1]} : vector<16x16xf32> to vector<16x1xf32>
    %2 = arith.fptosi %1 : vector<16x1xf32> to vector<16x1xi32>
    %3 = vector.extract_strided_slice %0 {offsets = [0, 14], sizes = [16, 1], strides = [1, 1]} : vector<16x16xf32> to vector<16x1xf32>
    %4 = arith.fptosi %3 : vector<16x1xf32> to vector<16x1xi32>
    %5 = tpu.iota {dimensions = array<i32: 1>} : vector<16x18xi32>
    %6 = vector.broadcast %2 : vector<16x1xi32> to vector<16x18xi32>
    %7 = arith.cmpi eq, %5, %6 : vector<16x18xi32>
    %8 = arith.extui %7 : vector<16x18xi1> to vector<16x18xi32>
    %9 = arith.sitofp %8 : vector<16x18xi32> to vector<16x18xf32>
    %10 = tpu.iota {dimensions = array<i32: 1>} : vector<16x2xi32>
    %11 = vector.broadcast %4 : vector<16x1xi32> to vector<16x2xi32>
    %12 = arith.cmpi eq, %10, %11 : vector<16x2xi32>
    %13 = arith.extui %12 : vector<16x2xi1> to vector<16x2xi32>
    %14 = arith.sitofp %13 : vector<16x2xi32> to vector<16x2xf32>
    %15 = vector.extract_strided_slice %0 {offsets = [0, 3], sizes = [16, 11], strides = [1, 1]} : vector<16x16xf32> to vector<16x11xf32>
    %16 = vector.extract_strided_slice %0 {offsets = [0, 15], sizes = [16, 1], strides = [1, 1]} : vector<16x16xf32> to vector<16x1xf32>
    %17 = tpu.concatenate %15, %16 in 1 : vector<16x11xf32>, vector<16x1xf32> -> vector<16x12xf32>
    %18 = tpu.concatenate %9, %14, %17 in 1 : vector<16x18xf32>, vector<16x2xf32>, vector<16x12xf32> -> vector<16x32xf32>
    %c0_1 = arith.constant 0 : index
    %c0_2 = arith.constant 0 : index
    %19 = vector.load %arg2[%c0_1, %c0_2] : memref<32x32xf32, #tpu.memory_space<vmem>>, vector<32x32xf32>
    %cst = arith.constant dense<0.000000e+00> : vector<16x32xf32>
    %20 = tpu.matmul %18, %19, %cst {dimension_numbers = #tpu.dot_dimension_numbers<[1], [0], [0], [1], [0, 0, 1, 1], [], []>} : vector<16x32xf32>, vector<32x32xf32>, vector<16x32xf32> -> vector<16x32xf32>
    %c0_3 = arith.constant 0 : index
    %c0_4 = arith.constant 0 : index
    %21 = vector.load %arg3[%c0_3, %c0_4] : memref<1x32xf32, #tpu.memory_space<vmem>>, vector<1x32xf32>
    %22 = vector.broadcast %21 : vector<1x32xf32> to vector<16x32xf32>
    %23 = arith.addf %20, %22 : vector<16x32xf32>
    %c0_5 = arith.constant 0 : index
    %c0_6 = arith.constant 0 : index
    %24 = vector.load %arg4[%c0_5, %c0_6] : memref<16x32xf32, #tpu.memory_space<vmem>>, vector<16x32xf32>
    tpu.vector_store %arg4[%c0_5, %c0_6], %23 {strides = array<i32>} : memref<16x32xf32, #tpu.memory_space<vmem>>, vector<16x32xf32>,
    return
  }
  func.func @transform_0(%arg0: i32) -> (i32, i32) {
    %c0_i32 = arith.constant 0 : i32
    %c0_i32_0 = arith.constant 0 : i32
    return %arg0, %c0_i32 : i32, i32
  }
  func.func @transform_1(%arg0: i32) -> (i32, i32) {
    %c0_i32 = arith.constant 0 : i32
    %c0_i32_0 = arith.constant 0 : i32
    %c0_i32_1 = arith.constant 0 : i32
    return %c0_i32, %c0_i32_0 : i32, i32
  }
  func.func @transform_2(%arg0: i32) -> (i32, i32) {
    %c0_i32 = arith.constant 0 : i32
    %c0_i32_0 = arith.constant 0 : i32
    %c0_i32_1 = arith.constant 0 : i32
    return %c0_i32, %c0_i32_0 : i32, i32
  }
  func.func @transform_3(%arg0: i32) -> (i32, i32) {
    %c0_i32 = arith.constant 0 : i32
    %c0_i32_0 = arith.constant 0 : i32
    return %arg0, %c0_i32 : i32, i32
  }
}

</mosaic_0001>

<bundles_post_ra>
// kernel: _item_encoder_impl.1
= control target key start
LH: loop header
LB: loop body
LE: loop exit
PB: predicated region body
PF: predicated region fallthrough
CT: control target
= control target key end

     0   :  { %v274_v2 = vmov 14   ;;  %s275_s16 = smov 125   ;;  %s343_s0 = inlined_call_operand.vmem [shape: f32[16,16], index: 0, kind: input, shape index: {}]   ;;  %s344_s1 = inlined_call_operand.vmem [shape: f32[32,32], index: 1, kind: input, shape index: {}]   ;;  %s345_s2 = inlined_call_operand.vmem [shape: f32[1,32], index: 2, kind: input, shape index: {}]   ;;  %s346_s3 = inlined_call_operand.hbm [shape: f32[16,32], index: 3, kind: output, shape index: {}]  }
   0x1   :  { %v15_v0 = vld [vmem:[%s343_s0] sm:$0xff]  ;;  %v16_v1 = vld [vmem:[%s343_s0 + $0x8] sm:$0xff]  ;;  %241 = vset.pattern.permute.xlu0 %v274_v2 }
   0x2   :  { %v227_v3 = vtrunc.f32 %v15_v0  ;;  %v229_v4 = vtrunc.f32 %v16_v1  ;;  %47 = vrot.lane.b32.xlu1 %v15_v0, %s275_s16 }
   0x3   :  { %8 = vsyncpa [#allocation3], 0  ;;  %v276_v5 = vmov 1   ;;  %s277_s17 = smov 124   ;;  %v84_v8 = vld [vmem:[%s344_s1] sm:$0xff]  ;;  %v85_v9 = vld [vmem:[%s344_s1 + $0x8] sm:$0xff]  ;;  %v19_v16 = vlaneseq }
   0x4   :  { %243 = vset.pattern.permute.xlu1 %v276_v5  ;;  %v228_v6 = vcvt.f32.s32 %v227_v3  ;;  %v230_v7 = vcvt.f32.s32 %v229_v4  ;;  %v219_v10 = vpack.c.bf16 %v85_v9, %v84_v8  ;;  %vm59_vm0 = vcmask 89088   ;;  %s278_s21 = smov 20   ;;  %v86_v14 = vld [vmem:[%s344_s1 + $0x10] sm:$0xff]  ;;  %v87_v15 = vld [vmem:[%s344_s1 + $0x18] sm:$0xff]  ;;  %s280_s26 = smov 18  }
   0x5   :  { %v223_v17 = vpack.c.bf16 %v87_v15, %v86_v14  ;;  %v20_v18 = vand.u32 127, %v19_v16  ;;  %v279_v22 = vmov 0.0   ;;  %vm78_vm5 = vcmask 146432   ;;  %v199_v41 = vld [vmem:[%s345_s2] ss:$0 sm:$0xff]  ;;  %s281_s28 = smov [#allocation2]  }
   0x6   :  { %34 = vperm.xlu0 %241, %v228_v6   ;;  %53 = vrot.lane.b32.xlu1 %v15_v0, %s277_s17  ;;  %vm81_vm6 = vcmask 162816   ;;  %vm95_vm7 = vcmask 261120   ;;  %s184_s29 = sshll.u32 %s281_s28, 4  ;;  %s185_s29 = int_to_ptr.vmem [resolvable:$true] %s184_s29 }
   0x7   :  { %220 = vmatprep.subr.bf16.mxu0 %v219_v10  ;;  %s250_s30 = scalar_lea.vmem %s185_s29, 256  ;;  %p255_p1 = scmp.lt.s32.totalorder %s185_s29, %s185_s29 }
   0x8   :  { %222 = vmatpush3.bf16.msra.mxu0 %v219_v10  ;;  %p251_p0 = scmp.ne.s32.totalorder %s185_s29, %s250_s30  ;;  %p256_p2 = scmp.lt.s32.totalorder %s250_s30, %s250_s30 }
   0x9   :  { %224 = vmatprep.subr.bf16.mxu0 %v223_v17 }
   0xa   :  { %37 = vperm.xlu0 %241, %v230_v7   ;;  %55 = vrot.lane.b32.xlu1 %v16_v1, %s277_s17  ;;  %p257_p3 = por %p256_p2, %p255_p1 }
   0xc   :  { %226 = vmatpush3.bf16.msra.mxu0 %v223_v17  ;;  %p258_p4 = pnand %p257_p3, %p251_p0 }
   0xe   :  { %49 = vrot.lane.b32.xlu0 %v16_v1, %s275_s16  ;;  %25 = vperm.xlu1 %243, %v230_v7  }
   0xf   :  { %242 = vset.pattern.permute.xlu0 %v276_v5 }
  0x12   :  { %22 = vperm.xlu0 %242, %v228_v6  }
  0x16   :  { %249 = vset.pattern.permute.xlu0 %v274_v2 }
  0x74   :  { %v48_v11 = vpop.permute.xlu1 %47 }
  0x78   :  { %v54_v12 = vpop.permute.xlu1 %53 }
  0x79   :  { %v60_v13 = vsel %vm59_vm0, %v48_v11, %v54_v12 }
  0x7a   :  { %72 = vrot.lane.b32.xlu0 %v60_v13, %s278_s21 }
  0x7c   :  { %v56_v21 = vpop.permute.xlu1 %55 }
  0x85   :  { %v35_v19 = vpop.permute.xlu0 %34 }
  0x86   :  { %vm39_vm1 = vcmp.eq.s32.totalorder %v20_v18, %v35_v19 }
  0x87   :  { %v197_v23 = vsel %vm39_vm1, 1.0, %v279_v22 }
  0x89   :  { %v38_v20 = vpop.permute.xlu0 %37 }
  0x8a   :  { %vm40_vm2 = vcmp.eq.s32.totalorder %v20_v18, %v38_v20 }
  0x8b   :  { %v198_v24 = vsel %vm40_vm2, 1.0, %v279_v22 }
  0x8c   :  { %v244_v25 = vpack.i.bf16 %v198_v24, %v197_v23 }
  0x8d   :  { %v50_v26 = vpop.permute.xlu0 %49  ;;  %v26_v27 = vpop.permute.xlu1 %25 }
  0x8e   :  { %245 = vrot.lane.b32.xlu1 %v244_v25, %s280_s26  ;;  %vm28_vm3 = vcmp.eq.s32.totalorder %v20_v18, %v26_v27  ;;  %v61_v28 = vsel %vm59_vm0, %v50_v26, %v56_v21 }
  0x8f   :  { %v196_v29 = vsel %vm28_vm3, 1.0, %v279_v22 }
  0x91   :  { %v23_v30 = vpop.permute.xlu0 %22 }
  0x92   :  { %74 = vrot.lane.b32.xlu1 %v61_v28, %s278_s21  ;;  %vm27_vm4 = vcmp.eq.s32.totalorder %v20_v18, %v23_v30 }
  0x93   :  { %v195_v31 = vsel %vm27_vm4, 1.0, %v279_v22 }
  0xec   :  { %v73_v35 = vpop.permute.xlu0 %72 }
 0x100   :  { %v246_v32 = vpop.permute.xlu1 %245 }
 0x101   :  { %v248_v33 = vunpack.i.h.bf16 %v246_v32  ;;  %v247_v34 = vunpack.i.l.bf16 %v246_v32 }
 0x103   :  { %v80_v36 = vsel %vm78_vm5, %v196_v29, %v248_v33  ;;  %v79_v37 = vsel %vm78_vm5, %v195_v31, %v247_v34 }
 0x104   :  { %v75_v38 = vpop.permute.xlu1 %74  ;;  %v82_v39 = vsel %vm81_vm6, %v79_v37, %v73_v35 }
 0x105   :  { %v83_v40 = vsel %vm81_vm6, %v80_v36, %v75_v38  ;;  %216 = vmatprep.mubr.msk.f32.mxu0 %vm95_vm7, %v82_v39 }
 0x106   :  { %217 = vmatmul.mubr.msk.f32.vlgmr.msra.gmra.mrb[0].mxu0 %vm95_vm7, %v83_v40 }
 0x1d9   :  { %v218_v42 = vpop.f32.mrb[0].mxu0 }
 0x1da   :  { %v174_v43 = vadd.f32 %v218_v42, %v199_v41  ;;  %v168_v44 = vpop.f32.mrb[1].mxu0 }
 0x1db   :  { %v169_v45 = vadd.f32 %v199_v41, %v168_v44 }
 0x1dc   :  { %178 = vst.msk [vmem:[#allocation2 + $0x8] sm:$0xff] %vm95_vm7, %v174_v43 }
 0x1dd   :  { %177 = vst.msk [vmem:[#allocation2] sm:$0xff] %vm95_vm7, %v169_v45 }
 0x1de   :  { %261 = shalt.err (!%p258_p4)
}
 0x1df   :  { %s262_s5 = scalar_lea.hbm %s346_s3, 256 }
 0x1e0   :  { %p263_p5 = scmp.ne.s32.totalorder %s346_s3, %s262_s5  ;;  %p266_p6 = scmp.lt.u32.totalorder %s262_s5, %s346_s3 }
 0x1e2   :  { %p268_p7 = pnand %p266_p6, %p263_p5 }
 0x1e4   :  { %271 = shalt.err (!%p268_p7)
}
 0x1e5   :  { %s282_s10 = smov 128   ;;  %s283_s11 = smov 8  }
 0x1e6   :  { %190 = dma.vmem_to_hbm [thread:$0]  %s185_s29, 256, %s346_s3, [#allocation3], %s282_s10, %s282_s10, %s283_s11  }
 0x1e7   :  { %272 = dma.done.wait [#allocation3], 256  }
 0x1e8   :  { %273 = vsyncadd [#allocation3], 4294967040 }
 0x1e9   :  { %194 = vsyncpa [#allocation3], 1 }

</bundles_post_ra>
